<compile_context>
chip_gen: v6e
topology: v6e:2x2x1
jax: 0.10.0
libtpu: 0.0.40
codegen_flags: <defaults>
</compile_context>

<pallas_src>
import functools

import jax
import jax.numpy as jnp
from jax.experimental import pallas as pl
from jax.experimental.pallas import tpu as pltpu

IMAGE_SIZE = 784
HIDDEN_SIZE = 256
OUT_COLS = 8          # narrow, lane-packed last layer; column 0 is the real output


def _round_up(n, m):
    return ((n + m - 1) // m) * m


def _leaky_relu(x, slope=0.2):
    return jnp.where(x >= 0, x, slope * x)


def discriminator_kernel(x_ref, w1_ref, b1_ref, w2_ref, b2_ref, w3_ref, b3_ref,
                         out_ref, *, approx_sigmoid):
    # Layer 1: (TB, 784) @ (784, 256); f32 MXU accumulation, LeakyReLU on f32.
    x = x_ref[...]
    h1 = jnp.dot(x, w1_ref[...], preferred_element_type=jnp.float32) + b1_ref[...]
    h1 = _leaky_relu(h1)

    # Layer 2: (TB, 256) @ (256, 256).
    h2 = jnp.dot(h1.astype(w2_ref.dtype), w2_ref[...],
                 preferred_element_type=jnp.float32) + b2_ref[...]
    h2 = _leaky_relu(h2)

    # Layer 3: (TB, 256) @ (256, 8) + sigmoid.  exp and reciprocal both go to
    # the EUP slot.  exp(-z) overflowing to +inf gives reciprocal 0, matching
    # sigmoid's limit.
    logits = jnp.dot(h2.astype(w3_ref.dtype), w3_ref[...],
                     preferred_element_type=jnp.float32) + b3_ref[...]
    p = jnp.exp(-logits)
    out_ref[...] = pl.reciprocal(1.0 + p, approx=approx_sigmoid).astype(out_ref.dtype)


def _choose_tb(B, tb):
    """Batch tile: prefer no batch padding and >= 2 grid steps (v7x megacore)."""
    tb = max(16, (tb // 16) * 16)
    if B <= 32:
        return _round_up(B, 16)           # tiny batch: one tile, minimal padding
    half = _round_up(-(-B // 2), 16)      # ceil(B/2): guarantees >= 2 grid steps
    cap = min(tb, half)
    for cand in (4096, 2048, 1024, 512, 256):   # exact divisors first (no padding)
        if cand <= cap and B % cand == 0:
            return cand
    return cap                            # fall back to padding the batch axis


def _tile_vmem_bytes(rows, cols, itemsize):
    return _round_up(max(rows, 1), 8) * _round_up(max(cols, 1), 128) * itemsize


def discriminator_forward(x, params, *, weights_dtype=None, tb=2048,
                          approx_sigmoid=True):
    """x: (B, 784) -> (B, 1) float32.

    weights_dtype: optional dtype (e.g. jnp.bfloat16) for the resident weight
    matrices; biases and accumulation stay float32.  To halve activation HBM
    traffic, hand in x already in bfloat16 from the producer (no wrapper cast
    is performed here).
    """
    w1, b1, w2, b2, w3, b3 = params
    B = x.shape[0]

    TB = _choose_tb(B, tb)
    Bp = _round_up(B, TB)

    # Only pad the batch axis, and only when strictly needed (never pad K).
    xp = x if Bp == B else jnp.pad(x, ((0, Bp - B), (0, 0)))

    # One-time, tiny pads of the last layer to a narrow lane-packed width.
    w3p = jnp.pad(w3, ((0, 0), (0, OUT_COLS - w3.shape[1])))
    b3p = jnp.pad(b3, ((0, 0), (0, OUT_COLS - b3.shape[1])))

    if weights_dtype is not None:
        w1 = w1.astype(weights_dtype)
        w2 = w2.astype(weights_dtype)
        w3p = w3p.astype(weights_dtype)
    # Biases stay float32 (added to the f32 accumulators).

    x_bytes = jnp.dtype(xp.dtype).itemsize
    w_bytes = jnp.dtype(w1.dtype).itemsize

    # VMEM budget: double-buffered x/out tiles + resident weights/biases
    # (budgeted at 2x to be safe) + live f32 activations, plus headroom.
    vmem_need = (
        2 * _tile_vmem_bytes(TB, IMAGE_SIZE, x_bytes)
        + 2 * _tile_vmem_bytes(TB, OUT_COLS, 4)
        + 2 * (_tile_vmem_bytes(IMAGE_SIZE, HIDDEN_SIZE, w_bytes)
               + _tile_vmem_bytes(HIDDEN_SIZE, HIDDEN_SIZE, w_bytes)
               + _tile_vmem_bytes(HIDDEN_SIZE, OUT_COLS, w_bytes)
               + 2 * _tile_vmem_bytes(1, HIDDEN_SIZE, 4)
               + _tile_vmem_bytes(1, OUT_COLS, 4))
        + 3 * _tile_vmem_bytes(TB, HIDDEN_SIZE, 4)
    )
    vmem_limit = int(min(100 << 20, max(vmem_need + (8 << 20), 16 << 20)))

    weight_hbm_bytes = sum(int(a.size) * jnp.dtype(a.dtype).itemsize
                           for a in (w1, b1, w2, b2, w3p, b3p))
    cost = pl.CostEstimate(
        flops=2 * Bp * (IMAGE_SIZE * HIDDEN_SIZE
                        + HIDDEN_SIZE * HIDDEN_SIZE
                        + HIDDEN_SIZE * OUT_COLS),
        transcendentals=Bp * OUT_COLS,
        bytes_accessed=int(xp.size) * x_bytes + Bp * OUT_COLS * 4 + weight_hbm_bytes,
    )

    def resident(a):
        # Constant block index: fetched once, stays VMEM-resident across steps.
        return pl.BlockSpec(a.shape, lambda i: (0,) * a.ndim)

    kernel = functools.partial(discriminator_kernel, approx_sigmoid=approx_sigmoid)

    out = pl.pallas_call(
        kernel,
        out_shape=jax.ShapeDtypeStruct((Bp, OUT_COLS), jnp.float32),
        grid=(Bp // TB,),
        in_specs=[
            pl.BlockSpec((TB, IMAGE_SIZE), lambda i: (i, 0)),  # x: tiled, unpadded K
            resident(w1), resident(b1),
            resident(w2), resident(b2),
            resident(w3p), resident(b3p),
        ],
        out_specs=pl.BlockSpec((TB, OUT_COLS), lambda i: (i, 0)),
        compiler_params=pltpu.CompilerParams(
            dimension_semantics=("parallel",),   # shard batch over v7x's 2 TCs
            vmem_limit_bytes=vmem_limit,
        ),
        cost_estimate=cost,
    )(xp, w1, b1, w2, b2, w3p, b3p)

    return out[:B, :1]


def init_params(key):
    """PyTorch nn.Linear default init: U[-1/sqrt(fan_in), +1/sqrt(fan_in)]."""
    ks = jax.random.split(key, 6)

    def linear(kw, kb, fan_in, fan_out):
        bound = 1.0 / jnp.sqrt(fan_in)
        w = jax.random.uniform(kw, (fan_in, fan_out), jnp.float32, -bound, bound)
        b = jax.random.uniform(kb, (1, fan_out), jnp.float32, -bound, bound)
        return w, b

    w1, b1 = linear(ks[0], ks[1], IMAGE_SIZE, HIDDEN_SIZE)
    w2, b2 = linear(ks[2], ks[3], HIDDEN_SIZE, HIDDEN_SIZE)
    w3, b3 = linear(ks[4], ks[5], HIDDEN_SIZE, 1)
    return (w1, b1, w2, b2, w3, b3)


def reference_forward(x, params):
    w1, b1, w2, b2, w3, b3 = params
    h1 = _leaky_relu(x @ w1 + b1)
    h2 = _leaky_relu(h1 @ w2 + b2)
    return jax.nn.sigmoid(h2 @ w3 + b3)


if __name__ == "__main__":
    key = jax.random.PRNGKey(0)
    k_params, k_x = jax.random.split(key)

    params = init_params(k_params)
    batch = 2
    x = jax.random.normal(k_x, (batch, IMAGE_SIZE), dtype=jnp.float32)

    ref = reference_forward(x, params)

    # Strict-accuracy path (exact reciprocal): tight check against the reference.
    out_strict = jax.block_until_ready(
        discriminator_forward(x, params, approx_sigmoid=False))
    assert out_strict.shape == (batch, 1)
    assert jnp.allclose(out_strict, ref, atol=1e-5, rtol=1e-5), (out_strict, ref)

    # Default fast path (EUP approx reciprocal): loose check.
    out_fast = jax.block_until_ready(discriminator_forward(x, params))
    assert out_fast.shape == (batch, 1)
    assert jnp.allclose(out_fast, ref, atol=1e-2), (out_fast, ref)

    # bf16 streaming path: producer supplies bf16 x, weights cast to bf16,
    # f32 accumulation in-kernel.
    out_bf16 = jax.block_until_ready(
        discriminator_forward(x.astype(jnp.bfloat16), params,
                              weights_dtype=jnp.bfloat16))
    assert out_bf16.shape == (batch, 1)
    assert jnp.allclose(out_bf16, ref, atol=3e-2), (out_bf16, ref)

    print("KERNEL_OK")
</pallas_src>

<mosaic_0001>
module attributes {stable_mosaic.version = 11 : i64} {
  func.func @discriminator_kernel(%arg0: i32, %arg1: memref<16x784xf32, #tpu.memory_space<vmem>>, %arg2: memref<784x256xf32, #tpu.memory_space<vmem>>, %arg3: memref<1x256xf32, #tpu.memory_space<vmem>>, %arg4: memref<256x256xf32, #tpu.memory_space<vmem>>, %arg5: memref<1x256xf32, #tpu.memory_space<vmem>>, %arg6: memref<256x8xf32, #tpu.memory_space<vmem>>, %arg7: memref<1x8xf32, #tpu.memory_space<vmem>>, %arg8: memref<16x8xf32, #tpu.memory_space<vmem>>) attributes {dimension_semantics = [#tpu.dimension_semantics<parallel>], iteration_bounds = array<i64: 1>, scalar_prefetch = 0 : i64, scratch_operands = 0 : i64, tpu.core_type = #tpu.core_type<tc>, window_params = [{transform_indices = @transform_0, window_bounds = array<i64: 16, 784>}, {pipeline_mode = #tpu.pipeline_mode<synchronous>, transform_indices = @transform_1, window_bounds = array<i64: 784, 256>}, {pipeline_mode = #tpu.pipeline_mode<synchronous>, transform_indices = @transform_2, window_bounds = array<i64: 1, 256>}, {pipeline_mode = #tpu.pipeline_mode<synchronous>, transform_indices = @transform_3, window_bounds = array<i64: 256, 256>}, {pipeline_mode = #tpu.pipeline_mode<synchronous>, transform_indices = @transform_4, window_bounds = array<i64: 1, 256>}, {pipeline_mode = #tpu.pipeline_mode<synchronous>, transform_indices = @transform_5, window_bounds = array<i64: 256, 8>}, {pipeline_mode = #tpu.pipeline_mode<synchronous>, transform_indices = @transform_6, window_bounds = array<i64: 1, 8>}, {transform_indices = @transform_7, window_bounds = array<i64: 16, 8>}]} {
    %c0 = arith.constant 0 : index
    %c0_0 = arith.constant 0 : index
    %0 = vector.load %arg1[%c0, %c0_0] : memref<16x784xf32, #tpu.memory_space<vmem>>, vector<16x784xf32>
    %c0_1 = arith.constant 0 : index
    %c0_2 = arith.constant 0 : index
    %1 = vector.load %arg2[%c0_1, %c0_2] : memref<784x256xf32, #tpu.memory_space<vmem>>, vector<784x256xf32>
    %cst = arith.constant dense<0.000000e+00> : vector<16x256xf32>
    %2 = tpu.matmul %0, %1, %cst {dimension_numbers = #tpu.dot_dimension_numbers<[1], [0], [0], [1], [0, 0, 1, 1], [], []>} : vector<16x784xf32>, vector<784x256xf32>, vector<16x256xf32> -> vector<16x256xf32>
    %c0_3 = arith.constant 0 : index
    %c0_4 = arith.constant 0 : index
    %3 = vector.load %arg3[%c0_3, %c0_4] : memref<1x256xf32, #tpu.memory_space<vmem>>, vector<1x256xf32>
    %4 = vector.broadcast %3 : vector<1x256xf32> to vector<16x256xf32>
    %5 = arith.addf %2, %4 : vector<16x256xf32>
    %cst_5 = arith.constant 0.000000e+00 : f32
    %6 = vector.broadcast %cst_5 : f32 to vector<16x256xf32>
    %7 = arith.cmpf oge, %5, %6 : vector<16x256xf32>
    %cst_6 = arith.constant 2.000000e-01 : f32
    %8 = vector.broadcast %cst_6 : f32 to vector<16x256xf32>
    %9 = arith.mulf %8, %5 : vector<16x256xf32>
    %10 = arith.select %7, %5, %9 : vector<16x256xi1>, vector<16x256xf32>
    %c0_7 = arith.constant 0 : index
    %c0_8 = arith.constant 0 : index
    %11 = vector.load %arg4[%c0_7, %c0_8] : memref<256x256xf32, #tpu.memory_space<vmem>>, vector<256x256xf32>
    %cst_9 = arith.constant dense<0.000000e+00> : vector<16x256xf32>
    %12 = tpu.matmul %10, %11, %cst_9 {dimension_numbers = #tpu.dot_dimension_numbers<[1], [0], [0], [1], [0, 0, 1, 1], [], []>} : vector<16x256xf32>, vector<256x256xf32>, vector<16x256xf32> -> vector<16x256xf32>
    %c0_10 = arith.constant 0 : index
    %c0_11 = arith.constant 0 : index
    %13 = vector.load %arg5[%c0_10, %c0_11] : memref<1x256xf32, #tpu.memory_space<vmem>>, vector<1x256xf32>
    %14 = vector.broadcast %13 : vector<1x256xf32> to vector<16x256xf32>
    %15 = arith.addf %12, %14 : vector<16x256xf32>
    %cst_12 = arith.constant 0.000000e+00 : f32
    %16 = vector.broadcast %cst_12 : f32 to vector<16x256xf32>
    %17 = arith.cmpf oge, %15, %16 : vector<16x256xf32>
    %cst_13 = arith.constant 2.000000e-01 : f32
    %18 = vector.broadcast %cst_13 : f32 to vector<16x256xf32>
    %19 = arith.mulf %18, %15 : vector<16x256xf32>
    %20 = arith.select %17, %15, %19 : vector<16x256xi1>, vector<16x256xf32>
    %c0_14 = arith.constant 0 : index
    %c0_15 = arith.constant 0 : index
    %21 = vector.load %arg6[%c0_14, %c0_15] : memref<256x8xf32, #tpu.memory_space<vmem>>, vector<256x8xf32>
    %cst_16 = arith.constant dense<0.000000e+00> : vector<16x8xf32>
    %22 = tpu.matmul %20, %21, %cst_16 {dimension_numbers = #tpu.dot_dimension_numbers<[1], [0], [0], [1], [0, 0, 1, 1], [], []>} : vector<16x256xf32>, vector<256x8xf32>, vector<16x8xf32> -> vector<16x8xf32>
    %c0_17 = arith.constant 0 : index
    %c0_18 = arith.constant 0 : index
    %23 = vector.load %arg7[%c0_17, %c0_18] : memref<1x8xf32, #tpu.memory_space<vmem>>, vector<1x8xf32>
    %24 = vector.broadcast %23 : vector<1x8xf32> to vector<16x8xf32>
    %25 = arith.addf %22, %24 : vector<16x8xf32>
    %cst_19 = arith.constant 0.000000e+00 : f32
    %26 = vector.broadcast %cst_19 : f32 to vector<16x8xf32>
    %27 = arith.subf %26, %25 : vector<16x8xf32>
    %28 = math.exp %27 : vector<16x8xf32>
    %cst_20 = arith.constant 1.000000e+00 : f32
    %29 = vector.broadcast %cst_20 : f32 to vector<16x8xf32>
    %30 = arith.addf %29, %28 : vector<16x8xf32>
    %31 = tpu.reciprocal %30 : vector<16x8xf32> -> vector<16x8xf32>
    %c0_21 = arith.constant 0 : index
    %c0_22 = arith.constant 0 : index
    %32 = vector.load %arg8[%c0_21, %c0_22] : memref<16x8xf32, #tpu.memory_space<vmem>>, vector<16x8xf32>
    tpu.vector_store %arg8[%c0_21, %c0_22], %31 {strides = array<i32>} : memref<16x8xf32, #tpu.memory_space<vmem>>, vector<16x8xf32>,
    return
  }
  func.func @transform_0(%arg0: i32) -> (i32, i32) {
    %c0_i32 = arith.constant 0 : i32
    %c0_i32_0 = arith.constant 0 : i32
    return %arg0, %c0_i32 : i32, i32
  }
  func.func @transform_1(%arg0: i32) -> (i32, i32) {
    %c0_i32 = arith.constant 0 : i32
    %c0_i32_0 = arith.constant 0 : i32
    %c0_i32_1 = arith.constant 0 : i32
    return %c0_i32, %c0_i32_0 : i32, i32
  }
  func.func @transform_2(%arg0: i32) -> (i32, i32) {
    %c0_i32 = arith.constant 0 : i32
    %c0_i32_0 = arith.constant 0 : i32
    %c0_i32_1 = arith.constant 0 : i32
    return %c0_i32, %c0_i32_0 : i32, i32
  }
  func.func @transform_3(%arg0: i32) -> (i32, i32) {
    %c0_i32 = arith.constant 0 : i32
    %c0_i32_0 = arith.constant 0 : i32
    %c0_i32_1 = arith.constant 0 : i32
    return %c0_i32, %c0_i32_0 : i32, i32
  }
  func.func @transform_4(%arg0: i32) -> (i32, i32) {
    %c0_i32 = arith.constant 0 : i32
    %c0_i32_0 = arith.constant 0 : i32
    %c0_i32_1 = arith.constant 0 : i32
    return %c0_i32, %c0_i32_0 : i32, i32
  }
  func.func @transform_5(%arg0: i32) -> (i32, i32) {
    %c0_i32 = arith.constant 0 : i32
    %c0_i32_0 = arith.constant 0 : i32
    %c0_i32_1 = arith.constant 0 : i32
    return %c0_i32, %c0_i32_0 : i32, i32
  }
  func.func @transform_6(%arg0: i32) -> (i32, i32) {
    %c0_i32 = arith.constant 0 : i32
    %c0_i32_0 = arith.constant 0 : i32
    %c0_i32_1 = arith.constant 0 : i32
    return %c0_i32, %c0_i32_0 : i32, i32
  }
  func.func @transform_7(%arg0: i32) -> (i32, i32) {
    %c0_i32 = arith.constant 0 : i32
    %c0_i32_0 = arith.constant 0 : i32
    return %arg0, %c0_i32 : i32, i32
  }
}

</mosaic_0001>

<bundles_post_ra>
// kernel: tpu_custom_call.1
= control target key start
LH: loop header
LB: loop body
LE: loop exit
PB: predicated region body
PF: predicated region fallthrough
CT: control target
= control target key end

     0   :  { %12 = vsyncpa [#allocation3], 0  ;;  %s1217_s0 = inlined_call_operand.vmem [shape: f32[16,784], index: 0, kind: input, shape index: {}]   ;;  %s1218_s1 = inlined_call_operand.hbm [shape: f32[784,256], index: 1, kind: input, shape index: {}]   ;;  %s1219_s2 = inlined_call_operand.vmem [shape: f32[1,256], index: 2, kind: input, shape index: {}]   ;;  %s1220_s3 = inlined_call_operand.hbm [shape: f32[256,256], index: 3, kind: input, shape index: {}]   ;;  %s1221_s4 = inlined_call_operand.vmem [shape: f32[1,256], index: 4, kind: input, shape index: {}]   ;;  %s1222_s5 = inlined_call_operand.vmem [shape: f32[256,8], index: 5, kind: input, shape index: {}]   ;;  %s1223_s6 = inlined_call_operand.vmem [shape: f32[1,8], index: 6, kind: input, shape index: {}]   ;;  %s1224_s7 = inlined_call_operand.vmem [shape: f32[16,8], index: 7, kind: output, shape index: {}]  }
   0x1   :  { %13 = vsyncpa [#allocation5], 0  ;;  %s999_s24 = smov [#allocation2]  }
   0x2   :  { %s21_s25 = sshll.u32 %s999_s24, 4  ;;  %s22_s25 = int_to_ptr.vmem [resolvable:$true] %s21_s25 }
   0x3   :  { %s963_s26 = scalar_lea.vmem %s22_s25, 25088  ;;  %p968_p1 = scmp.lt.s32.totalorder %s22_s25, %s22_s25 }
   0x4   :  { %p964_p0 = scmp.ne.s32.totalorder %s22_s25, %s963_s26  ;;  %p969_p2 = scmp.lt.s32.totalorder %s963_s26, %s963_s26 }
   0x6   :  { %p970_p3 = por %p969_p2, %p968_p1 }
   0x8   :  { %p971_p4 = pnand %p970_p3, %p964_p0 }
   0xa   :  { %974 = shalt.err (!%p971_p4)
}
   0xb   :  { %s1000_s27 = smov 256   ;;  %s1001_s28 = smov 16  }
   0xc   :  { %27 = dma.hbm_to_vmem [thread:$0]  %s1218_s1, 25088, %s22_s25, [#allocation3], %s1000_s27, %s1000_s27, %s1001_s28  }
   0xd   :  { %s1002_s8 = smov [#allocation4]  }
   0xe   :  { %s35_s9 = sshll.u32 %s1002_s8, 4  ;;  %s36_s9 = int_to_ptr.vmem [resolvable:$true] %s35_s9 }
   0xf   :  { %s983_s10 = scalar_lea.vmem %s36_s9, 8192  ;;  %p988_p6 = scmp.lt.s32.totalorder %s36_s9, %s36_s9 }
  0x10   :  { %p984_p5 = scmp.ne.s32.totalorder %s36_s9, %s983_s10  ;;  %p989_p7 = scmp.lt.s32.totalorder %s983_s10, %s983_s10 }
  0x12   :  { %p990_p8 = por %p989_p7, %p988_p6 }
  0x14   :  { %p991_p9 = pnand %p990_p8, %p984_p5 }
  0x16   :  { %994 = shalt.err (!%p991_p9)
}
  0x17   :  { %41 = dma.hbm_to_vmem [thread:$0]  %s1220_s3, 8192, %s36_s9, [#allocation5], %s1000_s27, %s1000_s27, %s1001_s28  }
  0x18   :  { %995 = dma.done.wait [#allocation3], 25088  }
  0x19   :  { %996 = vsyncadd [#allocation3], 4294942208 }
  0x1a   :  { %997 = dma.done.wait [#allocation5], 8192  }
  0x1b   :  { %998 = vsyncadd [#allocation5], 4294959104  ;;  %v99_v0 = vld [vmem:[#allocation2 + $0xf8] sm:$0xff]  ;;  %v98_v1 = vld [vmem:[#allocation2 + $0xf0] sm:$0xff]  ;;  %vm276_vm0 = vcmask 130048   ;;  %vm892_vm9 = vcmask 64512  }
  0x1c   :  { %v97_v2 = vld [vmem:[#allocation2 + $0xe8] sm:$0xff]  ;;  %283 = vmatprep.subr.mxu0 %v99_v0  ;;  %v163_v3 = vld [vmem:[#allocation2 + $0x2f8] sm:$0xff]  ;;  %v96_v4 = vld [vmem:[#allocation2 + $0xe0] sm:$0xff] }
  0x1d   :  { %v162_v5 = vld [vmem:[#allocation2 + $0x2f0] sm:$0xff]  ;;  %284 = vmatpush1.msra.mxu0 %v98_v1  ;;  %360 = vmatprep.subr.mxu1 %v163_v3  ;;  %v95_v6 = vld [vmem:[#allocation2 + $0xd8] sm:$0xff]  ;;  %v161_v7 = vld [vmem:[#allocation2 + $0x2e8] sm:$0xff] }
  0x1e   :  { %285 = vmatprep.subr.mxu0 %v97_v2  ;;  %361 = vmatpush1.msra.mxu1 %v162_v5  ;;  %v94_v8 = vld [vmem:[#allocation2 + $0xd0] sm:$0xff]  ;;  %v160_v9 = vld [vmem:[#allocation2 + $0x2e0] sm:$0xff]  ;;  %v159_v10 = vld [vmem:[#allocation2 + $0x2d8] sm:$0xff] }
  0x1f   :  { %286 = vmatpush1.msra.mxu0 %v96_v4  ;;  %362 = vmatprep.subr.mxu1 %v161_v7  ;;  %v93_v11 = vld [vmem:[#allocation2 + $0xc8] sm:$0xff]  ;;  %v158_v12 = vld [vmem:[#allocation2 + $0x2d0] sm:$0xff]  ;;  %v92_v13 = vld [vmem:[#allocation2 + $0xc0] sm:$0xff] }
  0x20   :  { %287 = vmatprep.subr.mxu0 %v95_v6  ;;  %363 = vmatpush1.msra.mxu1 %v160_v9  ;;  %v157_v14 = vld [vmem:[#allocation2 + $0x2c8] sm:$0xff]  ;;  %v91_v15 = vld [vmem:[#allocation2 + $0xb8] sm:$0xff]  ;;  %v156_v16 = vld [vmem:[#allocation2 + $0x2c0] sm:$0xff] }
  0x21   :  { %288 = vmatpush1.msra.mxu0 %v94_v8  ;;  %364 = vmatprep.subr.mxu1 %v159_v10  ;;  %v90_v17 = vld [vmem:[#allocation2 + $0xb0] sm:$0xff]  ;;  %v155_v18 = vld [vmem:[#allocation2 + $0x2b8] sm:$0xff]  ;;  %v89_v19 = vld [vmem:[#allocation2 + $0xa8] sm:$0xff] }
  0x22   :  { %289 = vmatprep.subr.mxu0 %v93_v11  ;;  %365 = vmatpush1.msra.mxu1 %v158_v12  ;;  %v154_v20 = vld [vmem:[#allocation2 + $0x2b0] sm:$0xff]  ;;  %v88_v21 = vld [vmem:[#allocation2 + $0xa0] sm:$0xff]  ;;  %v153_v22 = vld [vmem:[#allocation2 + $0x2a8] sm:$0xff] }
  0x23   :  { %290 = vmatpush1.msra.mxu0 %v92_v13  ;;  %366 = vmatprep.subr.mxu1 %v157_v14  ;;  %v87_v23 = vld [vmem:[#allocation2 + $0x98] sm:$0xff]  ;;  %v152_v24 = vld [vmem:[#allocation2 + $0x2a0] sm:$0xff]  ;;  %v86_v25 = vld [vmem:[#allocation2 + $0x90] sm:$0xff] }
  0x24   :  { %291 = vmatprep.subr.mxu0 %v91_v15  ;;  %367 = vmatpush1.msra.mxu1 %v156_v16  ;;  %v151_v26 = vld [vmem:[#allocation2 + $0x298] sm:$0xff]  ;;  %v85_v27 = vld [vmem:[#allocation2 + $0x88] sm:$0xff]  ;;  %v150_v28 = vld [vmem:[#allocation2 + $0x290] sm:$0xff] }
  0x25   :  { %292 = vmatpush1.msra.mxu0 %v90_v17  ;;  %368 = vmatprep.subr.mxu1 %v155_v18  ;;  %v84_v29 = vld [vmem:[#allocation2 + $0x80] sm:$0xff]  ;;  %v149_v30 = vld [vmem:[#allocation2 + $0x288] sm:$0xff]  ;;  %v83_v31 = vld [vmem:[#allocation2 + $0x78] sm:$0xff] }
  0x26   :  { %293 = vmatprep.subr.mxu0 %v89_v19  ;;  %369 = vmatpush1.msra.mxu1 %v154_v20  ;;  %v148_v32 = vld [vmem:[#allocation2 + $0x280] sm:$0xff]  ;;  %v82_v33 = vld [vmem:[#allocation2 + $0x70] sm:$0xff]  ;;  %v147_v34 = vld [vmem:[#allocation2 + $0x278] sm:$0xff] }
  0x27   :  { %294 = vmatpush1.msra.mxu0 %v88_v21  ;;  %370 = vmatprep.subr.mxu1 %v153_v22  ;;  %v81_v35 = vld [vmem:[#allocation2 + $0x68] sm:$0xff]  ;;  %v146_v36 = vld [vmem:[#allocation2 + $0x270] sm:$0xff]  ;;  %v80_v37 = vld [vmem:[#allocation2 + $0x60] sm:$0xff] }
  0x28   :  { %295 = vmatprep.subr.mxu0 %v87_v23  ;;  %371 = vmatpush1.msra.mxu1 %v152_v24  ;;  %v145_v38 = vld [vmem:[#allocation2 + $0x268] sm:$0xff]  ;;  %v79_v39 = vld [vmem:[#allocation2 + $0x58] sm:$0xff]  ;;  %v144_v40 = vld [vmem:[#allocation2 + $0x260] sm:$0xff] }
  0x29   :  { %296 = vmatpush1.msra.mxu0 %v86_v25  ;;  %372 = vmatprep.subr.mxu1 %v151_v26  ;;  %v78_v41 = vld [vmem:[#allocation2 + $0x50] sm:$0xff]  ;;  %v143_v42 = vld [vmem:[#allocation2 + $0x258] sm:$0xff]  ;;  %v77_v43 = vld [vmem:[#allocation2 + $0x48] sm:$0xff] }
  0x2a   :  { %297 = vmatprep.subr.mxu0 %v85_v27  ;;  %373 = vmatpush1.msra.mxu1 %v150_v28  ;;  %v142_v44 = vld [vmem:[#allocation2 + $0x250] sm:$0xff]  ;;  %v76_v45 = vld [vmem:[#allocation2 + $0x40] sm:$0xff]  ;;  %v141_v46 = vld [vmem:[#allocation2 + $0x248] sm:$0xff] }
  0x2b   :  { %298 = vmatpush1.msra.mxu0 %v84_v29  ;;  %374 = vmatprep.subr.mxu1 %v149_v30  ;;  %v75_v47 = vld [vmem:[#allocation2 + $0x38] sm:$0xff]  ;;  %v140_v48 = vld [vmem:[#allocation2 + $0x240] sm:$0xff]  ;;  %v74_v49 = vld [vmem:[#allocation2 + $0x30] sm:$0xff] }
  0x2c   :  { %299 = vmatprep.subr.mxu0 %v83_v31  ;;  %375 = vmatpush1.msra.mxu1 %v148_v32  ;;  %v139_v50 = vld [vmem:[#allocation2 + $0x238] sm:$0xff]  ;;  %v73_v51 = vld [vmem:[#allocation2 + $0x28] sm:$0xff]  ;;  %v138_v52 = vld [vmem:[#allocation2 + $0x230] sm:$0xff] }
  0x2d   :  { %300 = vmatpush1.msra.mxu0 %v82_v33  ;;  %376 = vmatprep.subr.mxu1 %v147_v34  ;;  %v72_v53 = vld [vmem:[#allocation2 + $0x20] sm:$0xff]  ;;  %v137_v54 = vld [vmem:[#allocation2 + $0x228] sm:$0xff]  ;;  %v71_v55 = vld [vmem:[#allocation2 + $0x18] sm:$0xff] }
  0x2e   :  { %301 = vmatprep.subr.mxu0 %v81_v35  ;;  %377 = vmatpush1.msra.mxu1 %v146_v36  ;;  %v136_v56 = vld [vmem:[#allocation2 + $0x220] sm:$0xff]  ;;  %v70_v57 = vld [vmem:[#allocation2 + $0x10] sm:$0xff]  ;;  %v135_v58 = vld [vmem:[#allocation2 + $0x218] sm:$0xff] }
  0x2f   :  { %302 = vmatpush1.msra.mxu0 %v80_v37  ;;  %378 = vmatprep.subr.mxu1 %v145_v38  ;;  %v69_v59 = vld [vmem:[#allocation2 + $0x8] sm:$0xff]  ;;  %v134_v60 = vld [vmem:[#allocation2 + $0x210] sm:$0xff]  ;;  %v68_v61 = vld [vmem:[#allocation2] sm:$0xff] }
  0x30   :  { %303 = vmatprep.subr.mxu0 %v79_v39  ;;  %379 = vmatpush1.msra.mxu1 %v144_v40  ;;  %v133_v62 = vld [vmem:[#allocation2 + $0x208] sm:$0xff]  ;;  %v131_v63 = vld [vmem:[#allocation2 + $0x1f8] sm:$0xff]  ;;  %v132_v0 = vld [vmem:[#allocation2 + $0x200] sm:$0xff] }
  0x31   :  { %304 = vmatpush1.msra.mxu0 %v78_v41  ;;  %380 = vmatprep.subr.mxu1 %v143_v42  ;;  %v130_v1 = vld [vmem:[#allocation2 + $0x1f0] sm:$0xff]  ;;  %v195_v2 = vld [vmem:[#allocation2 + $0x3f8] sm:$0xff]  ;;  %v129_v3 = vld [vmem:[#allocation2 + $0x1e8] sm:$0xff] }
  0x32   :  { %305 = vmatprep.subr.mxu0 %v77_v43  ;;  %381 = vmatpush1.msra.mxu1 %v142_v44  ;;  %v194_v4 = vld [vmem:[#allocation2 + $0x3f0] sm:$0xff]  ;;  %v128_v5 = vld [vmem:[#allocation2 + $0x1e0] sm:$0xff]  ;;  %v193_v6 = vld [vmem:[#allocation2 + $0x3e8] sm:$0xff] }
  0x33   :  { %306 = vmatpush1.msra.mxu0 %v76_v45  ;;  %382 = vmatprep.subr.mxu1 %v141_v46  ;;  %v127_v7 = vld [vmem:[#allocation2 + $0x1d8] sm:$0xff]  ;;  %v192_v8 = vld [vmem:[#allocation2 + $0x3e0] sm:$0xff]  ;;  %v126_v9 = vld [vmem:[#allocation2 + $0x1d0] sm:$0xff] }
  0x34   :  { %307 = vmatprep.subr.mxu0 %v75_v47  ;;  %383 = vmatpush1.msra.mxu1 %v140_v48  ;;  %v191_v10 = vld [vmem:[#allocation2 + $0x3d8] sm:$0xff]  ;;  %v125_v11 = vld [vmem:[#allocation2 + $0x1c8] sm:$0xff]  ;;  %v190_v12 = vld [vmem:[#allocation2 + $0x3d0] sm:$0xff] }
  0x35   :  { %308 = vmatpush1.msra.mxu0 %v74_v49  ;;  %384 = vmatprep.subr.mxu1 %v139_v50  ;;  %v124_v13 = vld [vmem:[#allocation2 + $0x1c0] sm:$0xff]  ;;  %v189_v14 = vld [vmem:[#allocation2 + $0x3c8] sm:$0xff]  ;;  %v123_v15 = vld [vmem:[#allocation2 + $0x1b8] sm:$0xff] }
  0x36   :  { %309 = vmatprep.subr.mxu0 %v73_v51  ;;  %385 = vmatpush1.msra.mxu1 %v138_v52  ;;  %v188_v16 = vld [vmem:[#allocation2 + $0x3c0] sm:$0xff]  ;;  %v122_v17 = vld [vmem:[#allocation2 + $0x1b0] sm:$0xff]  ;;  %v187_v18 = vld [vmem:[#allocation2 + $0x3b8] sm:$0xff] }
  0x37   :  { %310 = vmatpush1.msra.mxu0 %v72_v53  ;;  %386 = vmatprep.subr.mxu1 %v137_v54  ;;  %v121_v19 = vld [vmem:[#allocation2 + $0x1a8] sm:$0xff]  ;;  %v186_v20 = vld [vmem:[#allocation2 + $0x3b0] sm:$0xff]  ;;  %v120_v21 = vld [vmem:[#allocation2 + $0x1a0] sm:$0xff] }
  0x38   :  { %311 = vmatprep.subr.mxu0 %v71_v55  ;;  %387 = vmatpush1.msra.mxu1 %v136_v56  ;;  %v185_v22 = vld [vmem:[#allocation2 + $0x3a8] sm:$0xff]  ;;  %v119_v23 = vld [vmem:[#allocation2 + $0x198] sm:$0xff]  ;;  %v184_v24 = vld [vmem:[#allocation2 + $0x3a0] sm:$0xff] }
  0x39   :  { %312 = vmatpush1.msra.mxu0 %v70_v57  ;;  %388 = vmatprep.subr.mxu1 %v135_v58  ;;  %v118_v25 = vld [vmem:[#allocation2 + $0x190] sm:$0xff]  ;;  %v183_v26 = vld [vmem:[#allocation2 + $0x398] sm:$0xff]  ;;  %v117_v27 = vld [vmem:[#allocation2 + $0x188] sm:$0xff] }
  0x3a   :  { %313 = vmatprep.subr.mxu0 %v69_v59  ;;  %389 = vmatpush1.msra.mxu1 %v134_v60  ;;  %v182_v28 = vld [vmem:[#allocation2 + $0x390] sm:$0xff]  ;;  %v116_v29 = vld [vmem:[#allocation2 + $0x180] sm:$0xff]  ;;  %v181_v30 = vld [vmem:[#allocation2 + $0x388] sm:$0xff] }
  0x3b   :  { %314 = vmatpush1.msra.mxu0 %v68_v61  ;;  %390 = vmatprep.subr.mxu1 %v133_v62  ;;  %v115_v31 = vld [vmem:[#allocation2 + $0x178] sm:$0xff]  ;;  %v180_v32 = vld [vmem:[#allocation2 + $0x380] sm:$0xff]  ;;  %v114_v33 = vld [vmem:[#allocation2 + $0x170] sm:$0xff] }
  0x3c   :  { %315 = vmatprep.subr.mxu0 %v131_v63  ;;  %391 = vmatpush1.msra.mxu1 %v132_v0  ;;  %v179_v34 = vld [vmem:[#allocation2 + $0x378] sm:$0xff]  ;;  %v113_v35 = vld [vmem:[#allocation2 + $0x168] sm:$0xff]  ;;  %v178_v36 = vld [vmem:[#allocation2 + $0x370] sm:$0xff] }
  0x3d   :  { %316 = vmatpush2.msra.mxu0 %v130_v1  ;;  %392 = vmatprep.subr.mxu1 %v195_v2  ;;  %v112_v37 = vld [vmem:[#allocation2 + $0x160] sm:$0xff]  ;;  %v177_v38 = vld [vmem:[#allocation2 + $0x368] sm:$0xff]  ;;  %v111_v39 = vld [vmem:[#allocation2 + $0x158] sm:$0xff] }
  0x3e   :  { %317 = vmatprep.subr.mxu0 %v129_v3  ;;  %393 = vmatpush2.msra.mxu1 %v194_v4  ;;  %v176_v40 = vld [vmem:[#allocation2 + $0x360] sm:$0xff]  ;;  %v110_v41 = vld [vmem:[#allocation2 + $0x150] sm:$0xff]  ;;  %v175_v42 = vld [vmem:[#allocation2 + $0x358] sm:$0xff] }
  0x3f   :  { %318 = vmatpush2.msra.mxu0 %v128_v5  ;;  %394 = vmatprep.subr.mxu1 %v193_v6  ;;  %v109_v43 = vld [vmem:[#allocation2 + $0x148] sm:$0xff]  ;;  %v174_v44 = vld [vmem:[#allocation2 + $0x350] sm:$0xff]  ;;  %v108_v45 = vld [vmem:[#allocation2 + $0x140] sm:$0xff] }
  0x40   :  { %319 = vmatprep.subr.mxu0 %v127_v7  ;;  %395 = vmatpush2.msra.mxu1 %v192_v8  ;;  %v173_v46 = vld [vmem:[#allocation2 + $0x348] sm:$0xff]  ;;  %v107_v47 = vld [vmem:[#allocation2 + $0x138] sm:$0xff]  ;;  %v172_v48 = vld [vmem:[#allocation2 + $0x340] sm:$0xff] }
  0x41   :  { %320 = vmatpush2.msra.mxu0 %v126_v9  ;;  %396 = vmatprep.subr.mxu1 %v191_v10  ;;  %v106_v49 = vld [vmem:[#allocation2 + $0x130] sm:$0xff]  ;;  %v171_v50 = vld [vmem:[#allocation2 + $0x338] sm:$0xff]  ;;  %v105_v51 = vld [vmem:[#allocation2 + $0x128] sm:$0xff] }
  0x42   :  { %321 = vmatprep.subr.mxu0 %v125_v11  ;;  %397 = vmatpush2.msra.mxu1 %v190_v12  ;;  %v170_v52 = vld [vmem:[#allocation2 + $0x330] sm:$0xff]  ;;  %v104_v53 = vld [vmem:[#allocation2 + $0x120] sm:$0xff]  ;;  %v169_v54 = vld [vmem:[#allocation2 + $0x328] sm:$0xff] }
  0x43   :  { %322 = vmatpush2.msra.mxu0 %v124_v13  ;;  %398 = vmatprep.subr.mxu1 %v189_v14  ;;  %v103_v55 = vld [vmem:[#allocation2 + $0x118] sm:$0xff]  ;;  %v168_v56 = vld [vmem:[#allocation2 + $0x320] sm:$0xff]  ;;  %v102_v57 = vld [vmem:[#allocation2 + $0x110] sm:$0xff] }
  0x44   :  { %323 = vmatprep.subr.mxu0 %v123_v15  ;;  %399 = vmatpush2.msra.mxu1 %v188_v16  ;;  %v167_v58 = vld [vmem:[#allocation2 + $0x318] sm:$0xff]  ;;  %v101_v59 = vld [vmem:[#allocation2 + $0x108] sm:$0xff]  ;;  %v100_v61 = vld [vmem:[#allocation2 + $0x100] sm:$0xff] }
  0x45   :  { %324 = vmatpush2.msra.mxu0 %v122_v17  ;;  %400 = vmatprep.subr.mxu1 %v187_v18  ;;  %v55_v60 = vld [vmem:[%s1217_s0 + $0x8] sm:$0xff]  ;;  %v166_v62 = vld [vmem:[#allocation2 + $0x310] sm:$0xff]  ;;  %v54_v63 = vld [vmem:[%s1217_s0] sm:$0xff] }
  0x46   :  { %325 = vmatprep.subr.mxu0 %v121_v19  ;;  %401 = vmatpush2.msra.mxu1 %v186_v20  ;;  %v165_v0 = vld [vmem:[#allocation2 + $0x308] sm:$0xff]  ;;  %v227_v1 = vld [vmem:[#allocation2 + $0x4f8] sm:$0xff]  ;;  %v164_v2 = vld [vmem:[#allocation2 + $0x300] sm:$0xff] }
  0x47   :  { %326 = vmatpush2.msra.mxu0 %v120_v21  ;;  %402 = vmatprep.subr.mxu1 %v185_v22  ;;  %v57_v3 = vld [vmem:[%s1217_s0 + $0x18] sm:$0xff]  ;;  %v226_v4 = vld [vmem:[#allocation2 + $0x4f0] sm:$0xff]  ;;  %v225_v6 = vld [vmem:[#allocation2 + $0x4e8] sm:$0xff] }
  0x48   :  { %327 = vmatprep.subr.mxu0 %v119_v23  ;;  %403 = vmatpush2.msra.mxu1 %v184_v24  ;;  %v56_v5 = vld [vmem:[%s1217_s0 + $0x10] sm:$0xff]  ;;  %v224_v7 = vld [vmem:[#allocation2 + $0x4e0] sm:$0xff]  ;;  %v223_v9 = vld [vmem:[#allocation2 + $0x4d8] sm:$0xff] }
  0x49   :  { %328 = vmatpush2.msra.mxu0 %v118_v25  ;;  %404 = vmatprep.subr.mxu1 %v183_v26  ;;  %v62_v8 = vld [vmem:[%s1217_s0 + $0x40] sm:$0xff]  ;;  %v263_v10 = vld [vmem:[#allocation2 + $0x618] sm:$0xff]  ;;  %v222_v11 = vld [vmem:[#allocation2 + $0x4d0] sm:$0xff] }
  0x4a   :  { %329 = vmatprep.subr.mxu0 %v117_v27  ;;  %405 = vmatpush2.msra.mxu1 %v182_v28  ;;  %v262_v12 = vld [vmem:[#allocation2 + $0x610] sm:$0xff]  ;;  %v221_v13 = vld [vmem:[#allocation2 + $0x4c8] sm:$0xff]  ;;  %v61_v14 = vld [vmem:[%s1217_s0 + $0x38] sm:$0xff] }
  0x4b   :  { %330 = vmatpush2.msra.mxu0 %v116_v29  ;;  %406 = vmatprep.subr.mxu1 %v181_v30  ;;  %v220_v15 = vld [vmem:[#allocation2 + $0x4c0] sm:$0xff]  ;;  %v64_v16 = vld [vmem:[%s1217_s0 + $0x50] sm:$0xff]  ;;  %v219_v17 = vld [vmem:[#allocation2 + $0x4b8] sm:$0xff]  ;;  %v1003_v30 = vmov 0.0  }
  0x4c   :  { %331 = vmatprep.subr.mxu0 %v115_v31  ;;  %407 = vmatpush2.msra.mxu1 %v180_v32  ;;  %v63_v18 = vld [vmem:[%s1217_s0 + $0x48] sm:$0xff]  ;;  %v218_v19 = vld [vmem:[#allocation2 + $0x4b0] sm:$0xff]  ;;  %v260_v22 = vld [vmem:[#allocation2 + $0x600] sm:$0xff] }
  0x4d   :  { %332 = vmatpush2.msra.mxu0 %v114_v33  ;;  %408 = vmatprep.subr.mxu1 %v179_v34  ;;  %v261_v20 = vld [vmem:[#allocation2 + $0x608] sm:$0xff]  ;;  %v216_v23 = vld [vmem:[#allocation2 + $0x4a0] sm:$0xff]  ;;  %v215_v25 = vld [vmem:[#allocation2 + $0x498] sm:$0xff] }
  0x4e   :  { %333 = vmatprep.subr.mxu0 %v113_v35  ;;  %409 = vmatpush2.msra.mxu1 %v178_v36  ;;  %v217_v21 = vld [vmem:[#allocation2 + $0x4a8] sm:$0xff]  ;;  %v214_v26 = vld [vmem:[#allocation2 + $0x490] sm:$0xff]  ;;  %v212_v29 = vld [vmem:[#allocation2 + $0x480] sm:$0xff] }
  0x4f   :  { %334 = vmatpush2.msra.mxu0 %v112_v37  ;;  %410 = vmatprep.subr.mxu1 %v177_v38  ;;  %v59_v24 = vld [vmem:[%s1217_s0 + $0x28] sm:$0xff]  ;;  %v60_v27 = vld [vmem:[%s1217_s0 + $0x30] sm:$0xff]  ;;  %v211_v31 = vld [vmem:[#allocation2 + $0x478] sm:$0xff] }
  0x50   :  { %335 = vmatprep.subr.mxu0 %v111_v39  ;;  %411 = vmatpush2.msra.mxu1 %v176_v40  ;;  %v213_v28 = vld [vmem:[#allocation2 + $0x488] sm:$0xff]  ;;  %v210_v32 = vld [vmem:[#allocation2 + $0x470] sm:$0xff]  ;;  %v208_v35 = vld [vmem:[#allocation2 + $0x460] sm:$0xff] }
  0x51   :  { %336 = vmatpush2.msra.mxu0 %v110_v41  ;;  %412 = vmatprep.subr.mxu1 %v175_v42  ;;  %v67_v33 = vld [vmem:[%s1217_s0 + $0x68] sm:$0xff]  ;;  %v207_v36 = vld [vmem:[#allocation2 + $0x458] sm:$0xff]  ;;  %v206_v37 = vld [vmem:[#allocation2 + $0x450] sm:$0xff] }
  0x52   :  { %337 = vmatprep.subr.mxu0 %v109_v43  ;;  %413 = vmatpush2.msra.mxu1 %v174_v44  ;;  %v209_v34 = vld [vmem:[#allocation2 + $0x468] sm:$0xff]  ;;  %v204_v39 = vld [vmem:[#allocation2 + $0x440] sm:$0xff]  ;;  %v203_v40 = vld [vmem:[#allocation2 + $0x438] sm:$0xff] }
  0x53   :  { %338 = vmatpush2.msra.mxu0 %v108_v45  ;;  %414 = vmatprep.subr.mxu1 %v173_v46  ;;  %v205_v38 = vld [vmem:[#allocation2 + $0x448] sm:$0xff]  ;;  %v202_v41 = vld [vmem:[#allocation2 + $0x430] sm:$0xff]  ;;  %v200_v43 = vld [vmem:[#allocation2 + $0x420] sm:$0xff] }
  0x54   :  { %339 = vmatprep.subr.mxu0 %v107_v47  ;;  %415 = vmatpush2.msra.mxu1 %v172_v48  ;;  %v201_v42 = vld [vmem:[#allocation2 + $0x428] sm:$0xff]  ;;  %v199_v44 = vld [vmem:[#allocation2 + $0x418] sm:$0xff]  ;;  %v198_v45 = vld [vmem:[#allocation2 + $0x410] sm:$0xff] }
  0x55   :  { %340 = vmatpush2.msra.mxu0 %v106_v49  ;;  %416 = vmatprep.subr.mxu1 %v171_v50  ;;  %v197_v46 = vld [vmem:[#allocation2 + $0x408] sm:$0xff]  ;;  %v196_v47 = vld [vmem:[#allocation2 + $0x400] sm:$0xff]  ;;  %v259_v48 = vld [vmem:[#allocation2 + $0x5f8] sm:$0xff] }
  0x56   :  { %341 = vmatprep.subr.mxu0 %v105_v51  ;;  %417 = vmatpush2.msra.mxu1 %v170_v52  ;;  %v258_v49 = vld [vmem:[#allocation2 + $0x5f0] sm:$0xff]  ;;  %v257_v50 = vld [vmem:[#allocation2 + $0x5e8] sm:$0xff]  ;;  %v256_v51 = vld [vmem:[#allocation2 + $0x5e0] sm:$0xff] }
  0x57   :  { %342 = vmatpush2.msra.mxu0 %v104_v53  ;;  %418 = vmatprep.subr.mxu1 %v169_v54  ;;  %v255_v52 = vld [vmem:[#allocation2 + $0x5d8] sm:$0xff]  ;;  %v254_v53 = vld [vmem:[#allocation2 + $0x5d0] sm:$0xff]  ;;  %v253_v54 = vld [vmem:[#allocation2 + $0x5c8] sm:$0xff] }
  0x58   :  { %343 = vmatprep.subr.mxu0 %v103_v55  ;;  %419 = vmatpush2.msra.mxu1 %v168_v56  ;;  %v252_v55 = vld [vmem:[#allocation2 + $0x5c0] sm:$0xff]  ;;  %v251_v56 = vld [vmem:[#allocation2 + $0x5b8] sm:$0xff] }
  0x59   :  { %344 = vmatpush2.msra.mxu0 %v102_v57  ;;  %420 = vmatprep.subr.mxu1 %v167_v58  ;;  %v250_v57 = vld [vmem:[#allocation2 + $0x5b0] sm:$0xff]  ;;  %v249_v58 = vld [vmem:[#allocation2 + $0x5a8] sm:$0xff] }
  0x5a   :  { %345 = vmatprep.subr.mxu0 %v101_v59  ;;  %347 = vmatprep.mubr.f32.mxu0 %v55_v60  ;;  %v248_v59 = vld [vmem:[#allocation2 + $0x5a0] sm:$0xff]  ;;  %v247_v60 = vld [vmem:[#allocation2 + $0x598] sm:$0xff] }
  0x5b   :  { %346 = vmatpush2.msra.mxu0 %v100_v61  ;;  %421 = vmatpush2.msra.mxu1 %v166_v62  ;;  %v246_v61 = vld [vmem:[#allocation2 + $0x590] sm:$0xff]  ;;  %v245_v62 = vld [vmem:[#allocation2 + $0x588] sm:$0xff] }
  0x5c   :  { %348 = vmatmul.mubr.f32.vlgmr.msra.gmra.mxu0 %v54_v63  ;;  %422 = vmatprep.subr.mxu1 %v165_v0  ;;  %v244_v63 = vld [vmem:[#allocation2 + $0x580] sm:$0xff]  ;;  %v243_v0 = vld [vmem:[#allocation2 + $0x578] sm:$0xff] }
  0x5d   :  { %437 = vmatprep.subr.mxu0 %v227_v1  ;;  %423 = vmatpush2.msra.mxu1 %v164_v2  ;;  %v242_v1 = vld [vmem:[#allocation2 + $0x570] sm:$0xff]  ;;  %v241_v2 = vld [vmem:[#allocation2 + $0x568] sm:$0xff] }
  0x5e   :  { %424 = vmatprep.mubr.f32.mxu1 %v57_v3  ;;  %438 = vmatpush1.msra.mxu0 %v226_v4  ;;  %v240_v3 = vld [vmem:[#allocation2 + $0x560] sm:$0xff]  ;;  %v239_v4 = vld [vmem:[#allocation2 + $0x558] sm:$0xff] }
  0x5f   :  { %425 = vmatmul.mubr.f32.vlgmr.msra.gmra.mxu1 %v56_v5  ;;  %439 = vmatprep.subr.mxu0 %v225_v6  ;;  %v238_v5 = vld [vmem:[#allocation2 + $0x550] sm:$0xff]  ;;  %v237_v6 = vld [vmem:[#allocation2 + $0x548] sm:$0xff] }
  0x60   :  { %440 = vmatpush1.msra.mxu0 %v224_v7  ;;  %353 = vmatprep.mubr.f32.mxu0 %v62_v8  ;;  %v236_v7 = vld [vmem:[#allocation2 + $0x540] sm:$0xff]  ;;  %v235_v8 = vld [vmem:[#allocation2 + $0x538] sm:$0xff] }
  0x61   :  { %441 = vmatprep.subr.mxu0 %v223_v9  ;;  %542 = vmatprep.subr.mxu1 %v263_v10  ;;  %v234_v9 = vld [vmem:[#allocation2 + $0x530] sm:$0xff]  ;;  %v233_v10 = vld [vmem:[#allocation2 + $0x528] sm:$0xff] }
  0x62   :  { %442 = vmatpush1.msra.mxu0 %v222_v11  ;;  %543 = vmatpush1.msra.mxu1 %v262_v12  ;;  %v232_v11 = vld [vmem:[#allocation2 + $0x520] sm:$0xff]  ;;  %v231_v12 = vld [vmem:[#allocation2 + $0x518] sm:$0xff] }
  0x63   :  { %443 = vmatprep.subr.mxu0 %v221_v13  ;;  %354 = vmatmul.mubr.f32.gmra.mxu0 %v61_v14  ;;  %v230_v13 = vld [vmem:[#allocation2 + $0x510] sm:$0xff]  ;;  %v229_v14 = vld [vmem:[#allocation2 + $0x508] sm:$0xff] }
  0x64   :  { %444 = vmatpush1.msra.mxu0 %v220_v15  ;;  %430 = vmatprep.mubr.f32.mxu1 %v64_v16  ;;  %v228_v15 = vld [vmem:[#allocation2 + $0x500] sm:$0xff] }
  0x65   :  { %445 = vmatprep.subr.mxu0 %v219_v17  ;;  %431 = vmatmul.mubr.f32.gmra.mxu1 %v63_v18  ;;  %v58_v16 = vld [vmem:[%s1217_s0 + $0x20] sm:$0xff]  ;;  %v65_v18 = vld [vmem:[%s1217_s0 + $0x58] sm:$0xff] }
  0x66   :  { %446 = vmatpush1.msra.mxu0 %v218_v19  ;;  %544 = vmatprep.subr.mxu1 %v261_v20  ;;  %v66_v17 = vld [vmem:[%s1217_s0 + $0x60] sm:$0xff]  ;;  %v634_v19 = vld [vmem:[#allocation4 + $0xf8] sm:$0xff]  ;;  %v633_v20 = vld [vmem:[#allocation4 + $0xf0] sm:$0xff] }
  0x67   :  { %447 = vmatprep.subr.mxu0 %v217_v21  ;;  %545 = vmatpush1.msra.mxu1 %v260_v22  ;;  %v632_v21 = vld [vmem:[#allocation4 + $0xe8] sm:$0xff]  ;;  %v631_v22 = vld [vmem:[#allocation4 + $0xe0] sm:$0xff] }
  0x68   :  { %448 = vmatpush1.msra.mxu0 %v216_v23  ;;  %501 = vmatprep.mubr.f32.mxu0 %v59_v24  ;;  %v630_v23 = vld [vmem:[#allocation4 + $0xd8] sm:$0xff]  ;;  %v629_v24 = vld [vmem:[#allocation4 + $0xd0] sm:$0xff] }
  0x69   :  { %449 = vmatprep.subr.mxu0 %v215_v25  ;;  %578 = vmatprep.mubr.f32.mxu1 %v1003_v30  ;;  %v628_v25 = vld [vmem:[#allocation4 + $0xc8] sm:$0xff] }
  0x6a   :  { %450 = vmatpush1.msra.mxu0 %v214_v26  ;;  %901 = vmatmul.mubr.msk.f32.vlgmr.msra.gmra.mxu1 %vm276_vm0, %v60_v27  ;;  %v627_v26 = vld [vmem:[#allocation4 + $0xc0] sm:$0xff]  ;;  %v626_v27 = vld [vmem:[#allocation4 + $0xb8] sm:$0xff] }
  0x6b   :  { %451 = vmatprep.subr.mxu0 %v213_v28  ;;  %584 = vmatprep.mubr.f32.mxu1 %v1003_v30  ;;  %v625_v28 = vld [vmem:[#allocation4 + $0xb0] sm:$0xff]  ;;  %v623_v30 = vld [vmem:[#allocation4 + $0xa0] sm:$0xff] }
  0x6c   :  { %452 = vmatpush1.msra.mxu0 %v212_v29  ;;  %679 = vmatprep.subr.mxu1 %v634_v19  ;;  %v624_v29 = vld [vmem:[#allocation4 + $0xa8] sm:$0xff]  ;;  %v799_v19 = vld [vmem:[%s1222_s5 + $0xf8] sm:$0xff] }
  0x6d   :  { %453 = vmatprep.subr.mxu0 %v211_v31  ;;  %680 = vmatpush1.msra.mxu1 %v633_v20  ;;  %v622_v31 = vld [vmem:[#allocation4 + $0x98] sm:$0xff] }
  0x6e   :  { %454 = vmatpush1.msra.mxu0 %v210_v32  ;;  %902 = vmatmul.mubr.msk.f32.gmra.mxu1 %vm276_vm0, %v67_v33  ;;  %v621_v32 = vld [vmem:[#allocation4 + $0x90] sm:$0xff]  ;;  %v620_v33 = vld [vmem:[#allocation4 + $0x88] sm:$0xff]  ;;  %v783_v20 = vld [vmem:[%s1222_s5 + $0x78] sm:$0xff] }
  0x6f   :  { %455 = vmatprep.subr.mxu0 %v209_v34  ;;  %681 = vmatprep.subr.mxu1 %v632_v21  ;;  %v619_v34 = vld [vmem:[#allocation4 + $0x80] sm:$0xff]  ;;  %v798_v21 = vld [vmem:[%s1222_s5 + $0xf0] sm:$0xff] }
  0x70   :  { %456 = vmatpush1.msra.mxu0 %v208_v35  ;;  %682 = vmatpush1.msra.mxu1 %v631_v22  ;;  %v618_v35 = vld [vmem:[#allocation4 + $0x78] sm:$0xff]  ;;  %v782_v22 = vld [vmem:[%s1222_s5 + $0x70] sm:$0xff] }
  0x71   :  { %457 = vmatprep.subr.mxu0 %v207_v36  ;;  %683 = vmatprep.subr.mxu1 %v630_v23  ;;  %v617_v36 = vld [vmem:[#allocation4 + $0x70] sm:$0xff]  ;;  %v797_v23 = vld [vmem:[%s1222_s5 + $0xe8] sm:$0xff] }
  0x72   :  { %458 = vmatpush1.msra.mxu0 %v206_v37  ;;  %684 = vmatpush1.msra.mxu1 %v629_v24  ;;  %v616_v37 = vld [vmem:[#allocation4 + $0x68] sm:$0xff] }
  0x73   :  { %459 = vmatprep.subr.mxu0 %v205_v38  ;;  %685 = vmatprep.subr.mxu1 %v628_v25  ;;  %v615_v38 = vld [vmem:[#allocation4 + $0x60] sm:$0xff]  ;;  %v781_v24 = vld [vmem:[%s1222_s5 + $0x68] sm:$0xff] }
  0x74   :  { %460 = vmatpush1.msra.mxu0 %v204_v39  ;;  %686 = vmatpush1.msra.mxu1 %v627_v26  ;;  %v614_v39 = vld [vmem:[#allocation4 + $0x58] sm:$0xff]  ;;  %v796_v25 = vld [vmem:[%s1222_s5 + $0xe0] sm:$0xff] }
  0x75   :  { %461 = vmatprep.subr.mxu0 %v203_v40  ;;  %687 = vmatprep.subr.mxu1 %v626_v27  ;;  %v613_v40 = vld [vmem:[#allocation4 + $0x50] sm:$0xff]  ;;  %v780_v26 = vld [vmem:[%s1222_s5 + $0x60] sm:$0xff]  ;;  %v795_v27 = vld [vmem:[%s1222_s5 + $0xd8] sm:$0xff] }
  0x76   :  { %462 = vmatpush1.msra.mxu0 %v202_v41  ;;  %688 = vmatpush1.msra.mxu1 %v625_v28  ;;  %v612_v41 = vld [vmem:[#allocation4 + $0x48] sm:$0xff]  ;;  %v779_v28 = vld [vmem:[%s1222_s5 + $0x58] sm:$0xff] }
  0x77   :  { %463 = vmatprep.subr.mxu0 %v201_v42  ;;  %689 = vmatprep.subr.mxu1 %v624_v29  ;;  %v611_v42 = vld [vmem:[#allocation4 + $0x40] sm:$0xff]  ;;  %v794_v29 = vld [vmem:[%s1222_s5 + $0xd0] sm:$0xff] }
  0x78   :  { %464 = vmatpush1.msra.mxu0 %v200_v43  ;;  %690 = vmatpush1.msra.mxu1 %v623_v30  ;;  %v610_v43 = vld [vmem:[#allocation4 + $0x38] sm:$0xff]  ;;  %v778_v30 = vld [vmem:[%s1222_s5 + $0x50] sm:$0xff] }
  0x79   :  { %465 = vmatprep.subr.mxu0 %v199_v44  ;;  %691 = vmatprep.subr.mxu1 %v622_v31  ;;  %v609_v44 = vld [vmem:[#allocation4 + $0x30] sm:$0xff]  ;;  %v793_v31 = vld [vmem:[%s1222_s5 + $0xc8] sm:$0xff] }
  0x7a   :  { %466 = vmatpush1.msra.mxu0 %v198_v45  ;;  %692 = vmatpush1.msra.mxu1 %v621_v32  ;;  %v608_v45 = vld [vmem:[#allocation4 + $0x28] sm:$0xff] }
  0x7b   :  { %467 = vmatprep.subr.mxu0 %v197_v46  ;;  %693 = vmatprep.subr.mxu1 %v620_v33  ;;  %v607_v46 = vld [vmem:[#allocation4 + $0x20] sm:$0xff]  ;;  %v777_v32 = vld [vmem:[%s1222_s5 + $0x48] sm:$0xff] }
  0x7c   :  { %468 = vmatpush1.msra.mxu0 %v196_v47  ;;  %694 = vmatpush1.msra.mxu1 %v619_v34  ;;  %v606_v47 = vld [vmem:[#allocation4 + $0x18] sm:$0xff]  ;;  %v792_v33 = vld [vmem:[%s1222_s5 + $0xc0] sm:$0xff] }
  0x7d   :  { %469 = vmatprep.subr.mxu0 %v259_v48  ;;  %695 = vmatprep.subr.mxu1 %v618_v35  ;;  %v605_v48 = vld [vmem:[#allocation4 + $0x10] sm:$0xff]  ;;  %v776_v34 = vld [vmem:[%s1222_s5 + $0x40] sm:$0xff]  ;;  %v791_v35 = vld [vmem:[%s1222_s5 + $0xb8] sm:$0xff] }
  0x7e   :  { %470 = vmatpush2.msra.mxu0 %v258_v49  ;;  %696 = vmatpush1.msra.mxu1 %v617_v36  ;;  %v604_v49 = vld [vmem:[#allocation4 + $0x8] sm:$0xff]  ;;  %v775_v36 = vld [vmem:[%s1222_s5 + $0x38] sm:$0xff] }
  0x7f   :  { %471 = vmatprep.subr.mxu0 %v257_v50  ;;  %697 = vmatprep.subr.mxu1 %v616_v37  ;;  %v603_v50 = vld [vmem:[#allocation4] sm:$0xff]  ;;  %v790_v37 = vld [vmem:[%s1222_s5 + $0xb0] sm:$0xff] }
  0x80   :  { %472 = vmatpush2.msra.mxu0 %v256_v51  ;;  %698 = vmatpush1.msra.mxu1 %v615_v38  ;;  %v666_v51 = vld [vmem:[#allocation4 + $0x1f8] sm:$0xff]  ;;  %v774_v38 = vld [vmem:[%s1222_s5 + $0x30] sm:$0xff] }
  0x81   :  { %473 = vmatprep.subr.mxu0 %v255_v52  ;;  %699 = vmatprep.subr.mxu1 %v614_v39  ;;  %v665_v52 = vld [vmem:[#allocation4 + $0x1f0] sm:$0xff]  ;;  %v789_v39 = vld [vmem:[%s1222_s5 + $0xa8] sm:$0xff] }
  0x82   :  { %474 = vmatpush2.msra.mxu0 %v254_v53  ;;  %700 = vmatpush1.msra.mxu1 %v613_v40  ;;  %v664_v53 = vld [vmem:[#allocation4 + $0x1e8] sm:$0xff] }
  0x83   :  { %475 = vmatprep.subr.mxu0 %v253_v54  ;;  %701 = vmatprep.subr.mxu1 %v612_v41  ;;  %v663_v54 = vld [vmem:[#allocation4 + $0x1e0] sm:$0xff]  ;;  %v773_v40 = vld [vmem:[%s1222_s5 + $0x28] sm:$0xff] }
  0x84   :  { %476 = vmatpush2.msra.mxu0 %v252_v55  ;;  %702 = vmatpush1.msra.mxu1 %v611_v42  ;;  %v662_v55 = vld [vmem:[#allocation4 + $0x1d8] sm:$0xff]  ;;  %v788_v41 = vld [vmem:[%s1222_s5 + $0xa0] sm:$0xff]  ;;  %v266_v42 = vlaneseq }
  0x85   :  { %477 = vmatprep.subr.mxu0 %v251_v56  ;;  %703 = vmatprep.subr.mxu1 %v610_v43  ;;  %v661_v56 = vld [vmem:[#allocation4 + $0x1d0] sm:$0xff] }
  0x86   :  { %478 = vmatpush2.msra.mxu0 %v250_v57  ;;  %704 = vmatpush1.msra.mxu1 %v609_v44  ;;  %v660_v57 = vld [vmem:[#allocation4 + $0x1c8] sm:$0xff]  ;;  %v1163_v44 = vshrl.u32 %v266_v42, 7 }
  0x87   :  { %479 = vmatprep.subr.mxu0 %v249_v58  ;;  %705 = vmatprep.subr.mxu1 %v608_v45  ;;  %v659_v58 = vld [vmem:[#allocation4 + $0x1c0] sm:$0xff] }
  0x88   :  { %480 = vmatpush2.msra.mxu0 %v248_v59  ;;  %706 = vmatpush1.msra.mxu1 %v607_v46  ;;  %v658_v59 = vld [vmem:[#allocation4 + $0x1b8] sm:$0xff]  ;;  %v268_v46 = vsub.s32 0, %v1163_v44 }
  0x89   :  { %481 = vmatprep.subr.mxu0 %v247_v60  ;;  %707 = vmatprep.subr.mxu1 %v606_v47  ;;  %v657_v60 = vld [vmem:[#allocation4 + $0x1b0] sm:$0xff]  ;;  %v264_v47 = vld [vmem:[%s1219_s2] sm:$0x3] }
  0x8a   :  { %482 = vmatpush2.msra.mxu0 %v246_v61  ;;  %708 = vmatpush1.msra.mxu1 %v605_v48  ;;  %v656_v61 = vld [vmem:[#allocation4 + $0x1a8] sm:$0xff] }
  0x8b   :  { %483 = vmatprep.subr.mxu0 %v245_v62  ;;  %709 = vmatprep.subr.mxu1 %v604_v49  ;;  %v655_v62 = vld [vmem:[#allocation4 + $0x1a0] sm:$0xff] }
  0x8c   :  { %484 = vmatpush2.msra.mxu0 %v244_v63  ;;  %710 = vmatpush1.msra.mxu1 %v603_v50  ;;  %v654_v63 = vld [vmem:[#allocation4 + $0x198] sm:$0xff]  ;;  %v272_v50 = vsub.s32 1, %v1163_v44 }
  0x8d   :  { %485 = vmatprep.subr.mxu0 %v243_v0  ;;  %711 = vmatprep.subr.mxu1 %v666_v51  ;;  %v653_v0 = vld [vmem:[#allocation4 + $0x190] sm:$0xff]  ;;  %v269_v51 = vrot.slane %v264_v47, %v268_v46 }
  0x8e   :  { %486 = vmatpush2.msra.mxu0 %v242_v1  ;;  %712 = vmatpush2.msra.mxu1 %v665_v52  ;;  %v652_v1 = vld [vmem:[#allocation4 + $0x188] sm:$0xff] }
  0x8f   :  { %487 = vmatprep.subr.mxu0 %v241_v2  ;;  %713 = vmatprep.subr.mxu1 %v664_v53  ;;  %v651_v2 = vld [vmem:[#allocation4 + $0x180] sm:$0xff] }
  0x90   :  { %488 = vmatpush2.msra.mxu0 %v240_v3  ;;  %714 = vmatpush2.msra.mxu1 %v663_v54  ;;  %v650_v3 = vld [vmem:[#allocation4 + $0x178] sm:$0xff]  ;;  %v273_v54 = vrot.slane %v264_v47, %v272_v50 }
  0x91   :  { %489 = vmatprep.subr.mxu0 %v239_v4  ;;  %715 = vmatprep.subr.mxu1 %v662_v55  ;;  %v649_v4 = vld [vmem:[#allocation4 + $0x170] sm:$0xff] }
  0x92   :  { %490 = vmatpush2.msra.mxu0 %v238_v5  ;;  %716 = vmatpush2.msra.mxu1 %v661_v56  ;;  %v648_v5 = vld [vmem:[#allocation4 + $0x168] sm:$0xff] }
  0x93   :  { %491 = vmatprep.subr.mxu0 %v237_v6  ;;  %717 = vmatprep.subr.mxu1 %v660_v57  ;;  %v647_v6 = vld [vmem:[#allocation4 + $0x160] sm:$0xff] }
  0x94   :  { %492 = vmatpush2.msra.mxu0 %v236_v7  ;;  %718 = vmatpush2.msra.mxu1 %v659_v58  ;;  %v646_v7 = vld [vmem:[#allocation4 + $0x158] sm:$0xff] }
  0x95   :  { %493 = vmatprep.subr.mxu0 %v235_v8  ;;  %719 = vmatprep.subr.mxu1 %v658_v59  ;;  %v645_v8 = vld [vmem:[#allocation4 + $0x150] sm:$0xff] }
  0x96   :  { %494 = vmatpush2.msra.mxu0 %v234_v9  ;;  %720 = vmatpush2.msra.mxu1 %v657_v60  ;;  %v644_v9 = vld [vmem:[#allocation4 + $0x148] sm:$0xff] }
  0x97   :  { %495 = vmatprep.subr.mxu0 %v233_v10  ;;  %721 = vmatprep.subr.mxu1 %v656_v61  ;;  %v643_v10 = vld [vmem:[#allocation4 + $0x140] sm:$0xff] }
  0x98   :  { %496 = vmatpush2.msra.mxu0 %v232_v11  ;;  %722 = vmatpush2.msra.mxu1 %v655_v62  ;;  %v642_v11 = vld [vmem:[#allocation4 + $0x138] sm:$0xff] }
  0x99   :  { %497 = vmatprep.subr.mxu0 %v231_v12  ;;  %723 = vmatprep.subr.mxu1 %v654_v63  ;;  %v641_v12 = vld [vmem:[#allocation4 + $0x130] sm:$0xff] }
  0x9a   :  { %498 = vmatpush2.msra.mxu0 %v230_v13  ;;  %724 = vmatpush2.msra.mxu1 %v653_v0  ;;  %v640_v13 = vld [vmem:[#allocation4 + $0x128] sm:$0xff] }
  0x9b   :  { %499 = vmatprep.subr.mxu0 %v229_v14  ;;  %725 = vmatprep.subr.mxu1 %v652_v1  ;;  %v639_v14 = vld [vmem:[#allocation4 + $0x120] sm:$0xff] }
  0x9c   :  { %500 = vmatpush2.msra.mxu0 %v228_v15  ;;  %726 = vmatpush2.msra.mxu1 %v651_v2  ;;  %v638_v15 = vld [vmem:[#allocation4 + $0x118] sm:$0xff] }
  0x9d   :  { %502 = vmatmul.mubr.f32.vlgmr.msra.gmra.mxu0 %v58_v16  ;;  %727 = vmatprep.subr.mxu1 %v650_v3  ;;  %v637_v16 = vld [vmem:[#allocation4 + $0x110] sm:$0xff] }
  0x9e   :  { %507 = vmatprep.mubr.f32.mxu0 %v66_v17  ;;  %728 = vmatpush2.msra.mxu1 %v649_v4  ;;  %v636_v17 = vld [vmem:[#allocation4 + $0x108] sm:$0xff] }
  0x9f   :  { %729 = vmatprep.subr.mxu1 %v648_v5  ;;  %904 = vmatprep.subr.mxu0 %v799_v19 }
  0xa0   :  { %730 = vmatpush2.msra.mxu1 %v647_v6  ;;  %905 = vmatpush3.msra.mxu0 %v783_v20 }
  0xa1   :  { %508 = vmatmul.mubr.f32.gmra.mxu0 %v65_v18  ;;  %731 = vmatprep.subr.mxu1 %v646_v7  ;;  %v635_v18 = vld [vmem:[#allocation4 + $0x100] sm:$0xff] }
  0xa2   :  { %732 = vmatpush2.msra.mxu1 %v645_v8  ;;  %906 = vmatprep.subr.mxu0 %v798_v21 }
  0xa3   :  { %733 = vmatprep.subr.mxu1 %v644_v9  ;;  %907 = vmatpush3.msra.mxu0 %v782_v22 }
  0xa4   :  { %734 = vmatpush2.msra.mxu1 %v643_v10  ;;  %908 = vmatprep.subr.mxu0 %v797_v23 }
  0xa5   :  { %735 = vmatprep.subr.mxu1 %v642_v11  ;;  %909 = vmatpush3.msra.mxu0 %v781_v24 }
  0xa6   :  { %736 = vmatpush2.msra.mxu1 %v641_v12  ;;  %910 = vmatprep.subr.mxu0 %v796_v25  ;;  %v772_v25 = vld [vmem:[%s1222_s5 + $0x20] sm:$0xff] }
  0xa7   :  { %737 = vmatprep.subr.mxu1 %v640_v13  ;;  %911 = vmatpush3.msra.mxu0 %v780_v26  ;;  %v787_v26 = vld [vmem:[%s1222_s5 + $0x98] sm:$0xff] }
  0xa8   :  { %738 = vmatpush2.msra.mxu1 %v639_v14  ;;  %912 = vmatprep.subr.mxu0 %v795_v27  ;;  %v771_v27 = vld [vmem:[%s1222_s5 + $0x18] sm:$0xff] }
  0xa9   :  { %739 = vmatprep.subr.mxu1 %v638_v15  ;;  %913 = vmatpush3.msra.mxu0 %v779_v28  ;;  %v786_v28 = vld [vmem:[%s1222_s5 + $0x90] sm:$0xff] }
  0xaa   :  { %740 = vmatpush2.msra.mxu1 %v637_v16  ;;  %914 = vmatprep.subr.mxu0 %v794_v29  ;;  %v770_v29 = vld [vmem:[%s1222_s5 + $0x10] sm:$0xff] }
  0xab   :  { %741 = vmatprep.subr.mxu1 %v636_v17  ;;  %915 = vmatpush3.msra.mxu0 %v778_v30  ;;  %v785_v30 = vld [vmem:[%s1222_s5 + $0x88] sm:$0xff] }
  0xac   :  { %742 = vmatpush2.msra.mxu1 %v635_v18  ;;  %916 = vmatprep.subr.mxu0 %v793_v31  ;;  %v769_v31 = vld [vmem:[%s1222_s5 + $0x8] sm:$0xff] }
  0xad   :  { %917 = vmatpush3.msra.mxu0 %v777_v32  ;;  %v784_v32 = vld [vmem:[%s1222_s5 + $0x80] sm:$0xff] }
  0xae   :  { %918 = vmatprep.subr.mxu0 %v792_v33  ;;  %v768_v33 = vld [vmem:[%s1222_s5] sm:$0xff] }
  0xaf   :  { %919 = vmatpush3.msra.mxu0 %v776_v34  ;;  %v667_v34 = vld [vmem:[%s1221_s4] sm:$0x3] }
  0xb0   :  { %920 = vmatprep.subr.mxu0 %v791_v35  ;;  %v672_v35 = vrot.slane %v667_v34, %v268_v46 }
  0xb1   :  { %921 = vmatpush3.msra.mxu0 %v775_v36  ;;  %v676_v36 = vrot.slane %v667_v34, %v272_v50 }
  0xb2   :  { %922 = vmatprep.subr.mxu0 %v790_v37 }
  0xb3   :  { %923 = vmatpush3.msra.mxu0 %v774_v38 }
  0xb4   :  { %924 = vmatprep.subr.mxu0 %v789_v39 }
  0xb5   :  { %925 = vmatpush3.msra.mxu0 %v773_v40 }
  0xb6   :  { %926 = vmatprep.subr.mxu0 %v788_v41 }
  0xb7   :  { %927 = vmatpush3.msra.mxu0 %v772_v25 }
  0xb8   :  { %928 = vmatprep.subr.mxu0 %v787_v26 }
  0xb9   :  { %929 = vmatpush3.msra.mxu0 %v771_v27 }
  0xba   :  { %930 = vmatprep.subr.mxu0 %v786_v28 }
  0xbb   :  { %931 = vmatpush3.msra.mxu0 %v770_v29 }
  0xbc   :  { %932 = vmatprep.subr.mxu0 %v785_v30 }
  0xbd   :  { %933 = vmatpush3.msra.mxu0 %v769_v31 }
  0xbe   :  { %934 = vmatprep.subr.mxu0 %v784_v32 }
  0xbf   :  { %935 = vmatpush3.msra.mxu0 %v768_v33 }
 0x11c   :  { %v349_v48 = vpop.f32.mrf.mxu0 }
 0x11d   :  { %v350_v56 = vadd.f32 %v349_v48, %v269_v51 }
 0x11e   :  { %v351_v52 = vpop.f32.mrf.mxu0 }
 0x11f   :  { %v426_v43 = vpop.f32.mrf.mxu1  ;;  %v352_v58 = vadd.f32 %v351_v52, %v273_v54 }
 0x120   :  { %v427_v60 = vadd.f32 %v426_v43, %v350_v56 }
 0x121   :  { %v428_v45 = vpop.f32.mrf.mxu1 }
 0x122   :  { %v429_v0 = vadd.f32 %v428_v45, %v352_v58 }
 0x123   :  { %v355_v55 = vpop.f32.mrf.mxu0 }
 0x124   :  { %v356_v61 = vadd.f32 %v355_v55, %v269_v51 }
 0x125   :  { %v432_v49 = vpop.f32.mrf.mxu1  ;;  %v357_v59 = vpop.f32.mrf.mxu0 }
 0x126   :  { %v358_v1 = vadd.f32 %v357_v59, %v273_v54  ;;  %v433_v4 = vadd.f32 %v432_v49, %v356_v61  ;;  %v903_v54 = vld [vmem:[%s1223_s6] ss:$0 sm:$0xff] }
 0x127   :  { %v434_v53 = vpop.f32.mrf.mxu1 }
 0x128   :  { %v435_v9 = vadd.f32 %v434_v53, %v358_v1 }
 0x12a   :  { %v580_v57 = vpop.f32.mrf.mxu1 }
 0x12c   :  { %v582_v63 = vpop.f32.mrf.mxu1 }
 0x12e   :  { %v586_v8 = vpop.f32.mrf.mxu1 }
 0x130   :  { %v588_v17 = vpop.f32.mrf.mxu1 }
 0x15d   :  { %v503_v62 = vpop.f32.mrf.mxu0 }
 0x15e   :  { %v504_v2 = vadd.f32 %v503_v62, %v427_v60 }
 0x15f   :  { %v505_v3 = vpop.f32.mrf.mxu0 }
 0x160   :  { %v581_v5 = vadd.f32 %v580_v57, %v504_v2  ;;  %v506_v6 = vadd.f32 %v505_v3, %v429_v0 }
 0x161   :  { %v509_v7 = vpop.f32.mrf.mxu0 }
 0x162   :  { %v583_v10 = vadd.f32 %v582_v63, %v506_v6  ;;  %v510_v11 = vadd.f32 %v509_v7, %v433_v4  ;;  %v595_v12 = vmul.f32 0.2, %v581_v5  ;;  %vm591_vm1 = vcmp.ge.f32.partialorder %v581_v5, 0.0 }
 0x163   :  { %v511_v13 = vpop.f32.mrf.mxu0 }
 0x164   :  { %v596_v14 = vmul.f32 0.2, %v583_v10  ;;  %v587_v15 = vadd.f32 %v586_v8, %v510_v11  ;;  %v512_v16 = vadd.f32 %v511_v13, %v435_v9  ;;  %vm592_vm2 = vcmp.ge.f32.partialorder %v583_v10, 0.0 }
 0x165   :  { %v599_v20 = vsel %vm591_vm1, %v581_v5, %v595_v12 }
 0x166   :  { %v589_v18 = vadd.f32 %v588_v17, %v512_v16  ;;  %v600_v19 = vsel %vm592_vm2, %v583_v10, %v596_v14  ;;  %v597_v21 = vmul.f32 0.2, %v587_v15  ;;  %vm593_vm4 = vcmp.ge.f32.partialorder %v587_v15, 0.0 }
 0x167   :  { %743 = vmatprep.mubr.f32.mxu1 %v600_v19 }
 0x168   :  { %v598_v22 = vmul.f32 0.2, %v589_v18  ;;  %744 = vmatmul.mubr.f32.vlgmr.msra.gmra.mxu1 %v599_v20  ;;  %vm594_vm3 = vcmp.ge.f32.partialorder %v589_v18, 0.0  ;;  %v601_v24 = vsel %vm593_vm4, %v587_v15, %v597_v21 }
 0x16a   :  { %v602_v23 = vsel %vm594_vm3, %v589_v18, %v598_v22 }
 0x16b   :  { %749 = vmatprep.mubr.f32.mxu1 %v602_v23 }
 0x16c   :  { %750 = vmatmul.mubr.f32.gmra.mxu1 %v601_v24 }
 0x228   :  { %v745_v37 = vpop.f32.mrf.mxu1 }
 0x229   :  { %v746_v38 = vadd.f32 %v745_v37, %v672_v35 }
 0x22a   :  { %v747_v39 = vpop.f32.mrf.mxu1 }
 0x22b   :  { %v748_v40 = vadd.f32 %v747_v39, %v676_v36  ;;  %v760_v41 = vmul.f32 0.2, %v746_v38  ;;  %vm756_vm5 = vcmp.ge.f32.partialorder %v746_v38, 0.0 }
 0x22c   :  { %v751_v42 = vpop.f32.mrf.mxu1 }
 0x22d   :  { %v761_v43 = vmul.f32 0.2, %v748_v40  ;;  %v752_v45 = vadd.f32 %v751_v42, %v672_v35  ;;  %vm757_vm6 = vcmp.ge.f32.partialorder %v748_v40, 0.0  ;;  %v764_v51 = vsel %vm756_vm5, %v746_v38, %v760_v41 }
 0x22e   :  { %v753_v47 = vpop.f32.mrf.mxu1 }
 0x22f   :  { %v754_v48 = vadd.f32 %v753_v47, %v676_v36  ;;  %v765_v49 = vsel %vm757_vm6, %v748_v40, %v761_v43  ;;  %v762_v52 = vmul.f32 0.2, %v752_v45  ;;  %vm758_vm8 = vcmp.ge.f32.partialorder %v752_v45, 0.0 }
 0x230   :  { %871 = vmatprep.mubr.f32.mxu0 %v765_v49 }
 0x231   :  { %v763_v46 = vmul.f32 0.2, %v754_v48  ;;  %872 = vmatmul.mubr.f32.vlgmr.msra.gmra.mxu0 %v764_v51  ;;  %vm759_vm7 = vcmp.ge.f32.partialorder %v754_v48, 0.0  ;;  %v766_v50 = vsel %vm758_vm8, %v752_v45, %v762_v52 }
 0x233   :  { %v767_v44 = vsel %vm759_vm7, %v754_v48, %v763_v46 }
 0x234   :  { %876 = vmatprep.mubr.f32.mxu0 %v767_v44 }
 0x235   :  { %877 = vmatmul.mubr.f32.gmra.mxu0 %v766_v50 }
 0x2f1   :  { %v936_v53 = vpop.f32.mrf.mxu0 }
 0x2f3   :  { %v937_v55 = vpop.f32.mrf.mxu0 }
 0x2f4   :  { %v938_v56 = vadd.f32 %v937_v55, %v936_v53 }
 0x2f5   :  { %v939_v57 = vpop.f32.mrf.mxu0 }
 0x2f6   :  { %v874_v58 = vadd.f32 %v938_v56, %v903_v54 }
 0x2f7   :  { %v940_v59 = vpop.f32.mrf.mxu0 }
 0x2f8   :  { %v882_v60 = vsub.f32 0.0, %v874_v58  ;;  %v941_v61 = vadd.f32 %v940_v59, %v939_v57 }
 0x2fa   :  { %v884_v62 = vmul.f32 1.442695, %v882_v60  ;;  %v879_v63 = vadd.f32 %v941_v61, %v903_v54 }
 0x2fc   :  { %947 = vpow2.f32 %v884_v62  ;;  %v883_v0 = vsub.f32 0.0, %v879_v63 }
 0x2fe   :  { %v886_v1 = vmul.f32 1.442695, %v883_v0 }
 0x300   :  { %949 = vpow2.f32 %v886_v1 }
 0x309   :  { %v948_v2 = vpop.eup %947 }
 0x30a   :  { %v888_v3 = vadd.f32 1.0, %v948_v2 }
 0x30c   :  { %951 = vrcp.f32 %v888_v3 }
 0x30d   :  { %v950_v4 = vpop.eup %949 }
 0x30e   :  { %v889_v5 = vadd.f32 1.0, %v950_v4 }
 0x310   :  { %953 = vrcp.f32 %v889_v5 }
 0x319   :  { %v952_v6 = vpop.eup %951 }
 0x31a   :  { %893 = vst.msk [vmem:[%s1224_s7] sm:$0xff] %vm892_vm9, %v952_v6 }
 0x31d   :  { %v954_v7 = vpop.eup %953 }
 0x31e   :  { %894 = vst.msk [vmem:[%s1224_s7 + $0x8] sm:$0xff] %vm892_vm9, %v954_v7 }
 0x31f   :  { %899 = vsyncpa [#allocation3], 1 }
 0x320   :  { %900 = vsyncpa [#allocation5], 1 }

</bundles_post_ra>
